<compile_context>
chip_gen: v7x
topology: tpu7x:2x2x1
jax: 0.10.0
libtpu: 0.0.40
codegen_flags: <defaults>
</compile_context>

<pallas_src>
import functools

import jax
import jax.numpy as jnp
from jax.experimental import pallas as pl
from jax.experimental.pallas import tpu as pltpu


# ---------------------------------------------------------------------------
# Kernel
# ---------------------------------------------------------------------------
def attention_kernel(x_ref, w_ref, b_ref, o_ref, *, use_mxu):
    """One batch tile.

    x_ref: (TB, S, F)  input tile, native dtype (bf16 stays bf16)
    w_ref: (1, F)      projection weight, lane-dense layout of the (F, 1) param
    b_ref: (S, 1)      per-step bias, sublane-oriented (matches eij layout)
    o_ref: (TB, F)     output tile
    """
    x = x_ref[...]
    w = w_ref[...].astype(x.dtype)      # keep the product in x's dtype (bf16 VALUs on v6e/v7x)
    b = b_ref[...]                      # (S, 1) f32

    # Score path kept in a single (sublane=S, lane=1) orientation end-to-end:
    # eij/a are (TB, S, 1), so no lane<->sublane relayout is needed before the
    # final lane-broadcast into x.  The feature projection is an N=1-column
    # matmul, so it stays off the MXU (VPU multiply + lane reduce, f32 accum).
    eij = jnp.sum(x * w, axis=-1, keepdims=True, dtype=jnp.float32)   # (TB, S, 1)
    eij = jnp.tanh(eij + b)
    a = jnp.exp(eij)                                  # safe: tanh bounds eij to [-1, 1]
    denom = jnp.sum(a, axis=1, keepdims=True)         # (TB, 1, 1)
    # Exact divide (not approx reciprocal) so results track the PyTorch ref;
    # "+1e-10 after the divide" matches the original module.
    a = a / denom + 1e-10                             # (TB, S, 1) f32

    if use_mxu:
        # Large-S configs: weighted sum over steps goes through the MXU.
        out = jnp.einsum("bsf,bs->bf", x, a[..., 0].astype(x.dtype),
                         preferred_element_type=jnp.float32)
    else:
        # Small S: lane-broadcast of a + sublane reduce on the VPU/XLU.
        out = jnp.sum(x * a.astype(x.dtype), axis=1, dtype=jnp.float32)
    o_ref[...] = out.astype(o_ref.dtype)


# ---------------------------------------------------------------------------
# Sizing helpers (padded-VMEM aware)
# ---------------------------------------------------------------------------
def _device_kind() -> str:
    try:
        d = jax.devices()[0]
        return (getattr(d, "device_kind", "") or "").lower()
    except Exception:
        return ""


def _vmem_capacity_bytes(kind: str) -> int:
    cap = None
    try:
        cap = int(pltpu.get_tpu_info().vmem_capacity_bytes)
    except Exception:
        cap = None
    if not cap or cap <= 0:
        cap = 64 * 1024 * 1024            # conservative per-TC default
    if "v7" in kind:
        # v7x has 64 MiB per TensorCore; guard against a chip-level (2-TC) report.
        cap = min(cap, 64 * 1024 * 1024)
    return cap


def _padded_dims(n_sublane: int, n_lane: int, itemsize: int):
    """Extents after (8,128) tiling, with sub-32-bit sublane packing."""
    pack = 8 * max(1, 4 // max(itemsize, 1))   # f32 -> 8 rows, bf16 -> 16, int8 -> 32
    s_pad = -(-n_sublane // pack) * pack
    l_pad = -(-n_lane // 128) * 128
    return s_pad, l_pad


# ---------------------------------------------------------------------------
# Wrapper
# ---------------------------------------------------------------------------
def attention_forward(x, weight, bias, *, batch_tile=None, interpret=False):
    """x: (B, S, F); weight: (F, 1); bias: (S,). Returns (B, F)."""
    B, S, F = x.shape
    itemsize = jnp.dtype(x.dtype).itemsize
    kind = _device_kind()
    vmem_cap = _vmem_capacity_bytes(kind)

    # --- batch tile: target a few MiB of *padded* x block; smaller on v5e
    #     (slower HBM hides the 0.35 us/step overhead at modest tiles already),
    #     and cap so the grid has >= 4 steps when B allows (DMA/compute
    #     overlap + both v7x TensorCores get work on the "parallel" axis).
    target_block_bytes = (3 << 20) // 2 if "v5" in kind else (4 << 20)
    S_pad, F_pad = _padded_dims(S, F, itemsize)
    row_bytes = S_pad * F_pad * itemsize          # padded bytes of one x row in VMEM
    if batch_tile is None:
        tb = max(1, target_block_bytes // row_bytes)
        if B >= 32:
            tb = min(tb, pl.cdiv(B, 4))
        if tb >= 8:
            tb = (tb // 8) * 8                    # sublane-friendly output rows
    else:
        tb = batch_tile
    tb = max(1, min(tb, B))
    grid = (pl.cdiv(B, tb),)

    # --- scoped VMEM limit from the padded working set with ~2x headroom,
    #     clamped to the per-TensorCore capacity.
    x_block = tb * row_bytes                                  # one x buffer
    tbp, Fop = _padded_dims(tb, F, itemsize)
    out_block = tbp * Fop * itemsize                          # one out buffer
    sp32, lp32 = _padded_dims(S, 1, 4)
    temp_block = 4 * tb * sp32 * lp32 * 4                     # f32 eij/a/denominator temps
    working = 2 * x_block + 2 * out_block + temp_block        # double-buffered in/out + temps
    vmem_limit = int(min(vmem_cap, max(2 * working + (8 << 20), 16 << 20)))

    w2d = weight.reshape(1, F).astype(jnp.float32)            # lane-dense weight
    b2d = bias.reshape(S, 1).astype(jnp.float32)              # sublane-oriented bias

    # MXU only pays off once S reaches the systolic width for the generation.
    use_mxu = S >= (128 if "v5" in kind else 256)
    kernel = functools.partial(attention_kernel, use_mxu=use_mxu)

    # TODO(synk): if xprof shows exposed DMA between steps on v7x, add
    # pipeline_mode=pl.Buffered(3) to the x BlockSpec (budget above allows it).
    # TODO(synk): F=32 leaves 96/128 lanes dead and the (tb, F) store masked;
    # only fixable by a lane-dense upstream layout (pad F / fold S*F onto
    # lanes) — a separate HBM transpose pass just for this would cost more.
    return pl.pallas_call(
        kernel,
        out_shape=jax.ShapeDtypeStruct((B, F), x.dtype),
        grid=grid,
        in_specs=[
            pl.BlockSpec((tb, S, F), lambda i: (i, 0, 0)),   # stream x by batch tile
            pl.BlockSpec((1, F), lambda i: (0, 0)),          # weight replicated
            pl.BlockSpec((S, 1), lambda i: (0, 0)),          # bias replicated
        ],
        out_specs=pl.BlockSpec((tb, F), lambda i: (i, 0)),
        compiler_params=pltpu.CompilerParams(
            dimension_semantics=("parallel",),               # batch tiles independent
            vmem_limit_bytes=vmem_limit,
        ),
        interpret=interpret,
    )(x, w2d, b2d)


# ---------------------------------------------------------------------------
# Pure-JAX reference (mirrors the PyTorch code exactly)
# ---------------------------------------------------------------------------
def attention_ref(x, weight, bias):
    B, S, F = x.shape
    eij = (x.reshape(-1, F) @ weight).reshape(-1, S)
    eij = jnp.tanh(eij + bias)
    a = jnp.exp(eij)
    a = a / jnp.sum(a, axis=1, keepdims=True) + 1e-10
    return jnp.sum(x * a[..., None], axis=1)


if __name__ == "__main__":
    key = jax.random.PRNGKey(0)
    kx, kw, kx2 = jax.random.split(key, 3)

    # Small shapes consistent with the module: step_dim=8, feature_dim=32.
    B, S, F = 2, 8, 32
    x = jax.random.normal(kx, (B, S, F), dtype=jnp.float32)

    # Deterministic params: xavier_uniform for weight (F, 1), zeros for bias.
    bound = (6.0 / (F + 1)) ** 0.5
    weight = jax.random.uniform(kw, (F, 1), dtype=jnp.float32,
                                minval=-bound, maxval=bound)
    bias = jnp.zeros((S,), dtype=jnp.float32)

    out = jax.block_until_ready(attention_forward(x, weight, bias))
    ref = attention_ref(x, weight, bias)
    assert out.shape == (B, F)
    assert jnp.allclose(out, ref, atol=1e-5, rtol=1e-5)

    # Exercise the batch-tiled grid (multiple pipelined steps).
    B2 = 24
    x2 = jax.random.normal(kx2, (B2, S, F), dtype=jnp.float32)
    out2 = jax.block_until_ready(attention_forward(x2, weight, bias, batch_tile=8))
    ref2 = attention_ref(x2, weight, bias)
    assert out2.shape == (B2, F)
    assert jnp.allclose(out2, ref2, atol=1e-5, rtol=1e-5)

    print("KERNEL_OK")
</pallas_src>

<mosaic_0001>
module attributes {stable_mosaic.version = 11 : i64} {
  func.func @attention_kernel(%arg0: i32, %arg1: memref<2x8x32xf32, #tpu.memory_space<vmem>>, %arg2: memref<1x32xf32, #tpu.memory_space<vmem>>, %arg3: memref<8x1xf32, #tpu.memory_space<vmem>>, %arg4: memref<2x32xf32, #tpu.memory_space<vmem>>) attributes {dimension_semantics = [#tpu.dimension_semantics<parallel>], iteration_bounds = array<i64: 1>, scalar_prefetch = 0 : i64, scratch_operands = 0 : i64, tpu.core_type = #tpu.core_type<tc>, window_params = [{transform_indices = @transform_0, window_bounds = array<i64: 2, 8, 32>}, {pipeline_mode = #tpu.pipeline_mode<synchronous>, transform_indices = @transform_1, window_bounds = array<i64: 1, 32>}, {pipeline_mode = #tpu.pipeline_mode<synchronous>, transform_indices = @transform_2, window_bounds = array<i64: 8, 1>}, {transform_indices = @transform_3, window_bounds = array<i64: 2, 32>}]} {
    %c0 = arith.constant 0 : index
    %c0_0 = arith.constant 0 : index
    %c0_1 = arith.constant 0 : index
    %0 = vector.load %arg1[%c0, %c0_0, %c0_1] : memref<2x8x32xf32, #tpu.memory_space<vmem>>, vector<2x8x32xf32>
    %c0_2 = arith.constant 0 : index
    %c0_3 = arith.constant 0 : index
    %1 = vector.load %arg2[%c0_2, %c0_3] : memref<1x32xf32, #tpu.memory_space<vmem>>, vector<1x32xf32>
    %c0_4 = arith.constant 0 : index
    %c0_5 = arith.constant 0 : index
    %2 = vector.load %arg3[%c0_4, %c0_5] : memref<8x1xf32, #tpu.memory_space<vmem>>, vector<8x1xf32>
    %3 = vector.shape_cast %1 : vector<1x32xf32> to vector<1x1x32xf32>
    %4 = vector.broadcast %3 : vector<1x1x32xf32> to vector<2x8x32xf32>
    %5 = arith.mulf %0, %4 : vector<2x8x32xf32>
    %cst = arith.constant dense<0.000000e+00> : vector<2x8xf32>
    %6 = vector.multi_reduction <add>, %5, %cst [2] : vector<2x8x32xf32> to vector<2x8xf32>
    %7 = vector.shape_cast %6 : vector<2x8xf32> to vector<2x8x1xf32>
    %8 = vector.shape_cast %2 : vector<8x1xf32> to vector<1x8x1xf32>
    %9 = vector.broadcast %8 : vector<1x8x1xf32> to vector<2x8x1xf32>
    %10 = arith.addf %7, %9 : vector<2x8x1xf32>
    %11 = math.tanh %10 : vector<2x8x1xf32>
    %12 = math.exp %11 : vector<2x8x1xf32>
    %cst_6 = arith.constant dense<0.000000e+00> : vector<2x1xf32>
    %13 = vector.multi_reduction <add>, %12, %cst_6 [1] : vector<2x8x1xf32> to vector<2x1xf32>
    %14 = vector.shape_cast %13 : vector<2x1xf32> to vector<2x1x1xf32>
    %15 = vector.broadcast %14 : vector<2x1x1xf32> to vector<2x8x1xf32>
    %16 = arith.divf %12, %15 : vector<2x8x1xf32>
    %cst_7 = arith.constant 1.000000e-10 : f32
    %17 = vector.broadcast %cst_7 : f32 to vector<2x8x1xf32>
    %18 = arith.addf %16, %17 : vector<2x8x1xf32>
    %19 = vector.broadcast %18 : vector<2x8x1xf32> to vector<2x8x32xf32>
    %20 = arith.mulf %0, %19 : vector<2x8x32xf32>
    %cst_8 = arith.constant dense<0.000000e+00> : vector<2x32xf32>
    %21 = vector.multi_reduction <add>, %20, %cst_8 [1] : vector<2x8x32xf32> to vector<2x32xf32>
    %c0_9 = arith.constant 0 : index
    %c0_10 = arith.constant 0 : index
    %22 = vector.load %arg4[%c0_9, %c0_10] : memref<2x32xf32, #tpu.memory_space<vmem>>, vector<2x32xf32>
    tpu.vector_store %arg4[%c0_9, %c0_10], %21 {strides = array<i32>} : memref<2x32xf32, #tpu.memory_space<vmem>>, vector<2x32xf32>,
    return
  }
  func.func @transform_0(%arg0: i32) -> (i32, i32, i32) {
    %c0_i32 = arith.constant 0 : i32
    %c0_i32_0 = arith.constant 0 : i32
    %c0_i32_1 = arith.constant 0 : i32
    return %arg0, %c0_i32, %c0_i32_0 : i32, i32, i32
  }
  func.func @transform_1(%arg0: i32) -> (i32, i32) {
    %c0_i32 = arith.constant 0 : i32
    %c0_i32_0 = arith.constant 0 : i32
    %c0_i32_1 = arith.constant 0 : i32
    return %c0_i32, %c0_i32_0 : i32, i32
  }
  func.func @transform_2(%arg0: i32) -> (i32, i32) {
    %c0_i32 = arith.constant 0 : i32
    %c0_i32_0 = arith.constant 0 : i32
    %c0_i32_1 = arith.constant 0 : i32
    return %c0_i32, %c0_i32_0 : i32, i32
  }
  func.func @transform_3(%arg0: i32) -> (i32, i32) {
    %c0_i32 = arith.constant 0 : i32
    %c0_i32_0 = arith.constant 0 : i32
    return %arg0, %c0_i32 : i32, i32
  }
}

</mosaic_0001>

<bundles_post_ra>
// kernel: tpu_custom_call.1
= control target key start
LH: loop header
LB: loop body
LE: loop exit
PB: predicated region body
PF: predicated region fallthrough
CT: control target
= control target key end

     0   :  { %8 = vsyncpa [#allocation3], 0  ;;  %s252_s0 = inlined_call_operand.hbm [shape: f32[2,8,32], index: 0, kind: input, shape index: {}]   ;;  %s253_s1 = inlined_call_operand.vmem [shape: f32[1,32], index: 1, kind: input, shape index: {}]   ;;  %s254_s2 = inlined_call_operand.vmem [shape: f32[8,1], index: 2, kind: input, shape index: {}]   ;;  %s255_s3 = inlined_call_operand.hbm [shape: f32[2,32], index: 3, kind: output, shape index: {}]  }
   0x1   :  { %9 = vsyncpa [#allocation4], 0  ;;  %s193_s12 = smov [#allocation2]   ;;  %s145_s16 = scalar_lea.hbm %s252_s0, 256 }
   0x2   :  { %s15_s13 = sshll.u32 %s193_s12, 4  ;;  %p146_p0 = scmp.ne.s32.totalorder %s252_s0, %s145_s16  ;;  %s16_s13 = int_to_ptr.vmem [resolvable:$true] %s15_s13 }
   0x3   :  { %p149_p1 = scmp.lt.u32.totalorder %s145_s16, %s252_s0 }
   0x5   :  { %p151_p2 = pnand %p149_p1, %p146_p0 }
   0x7   :  { %154 = shalt.err (!%p151_p2)
}
   0x8   :  { %s155_s21 = scalar_lea.vmem %s16_s13, 256  ;;  %p160_p4 = scmp.lt.s32.totalorder %s16_s13, %s16_s13 }
   0x9   :  { %p156_p3 = scmp.ne.s32.totalorder %s16_s13, %s155_s21  ;;  %p161_p5 = scmp.lt.s32.totalorder %s155_s21, %s155_s21 }
   0xb   :  { %p162_p6 = por %p161_p5, %p160_p4 }
   0xd   :  { %p163_p7 = pnand %p162_p6, %p156_p3 }
   0xf   :  { %166 = shalt.err (!%p163_p7)
}
  0x10   :  { %s194_s22 = smov 128   ;;  %s195_s23 = smov 8  }
  0x11   :  { %21 = dma.hbm_to_vmem [thread:$0]  %s252_s0, 256, %s16_s13, [#allocation3], %s194_s22, %s194_s22, %s195_s23  }
  0x12   :  { %189 = dma.done.wait [#allocation3], 256  }
  0x13   :  { %190 = vsyncadd [#allocation3], 4294967040  ;;  %v29_v0 = vld [vmem:[#allocation2] sm:$0xff]  ;;  %vm41_vm0 = vcmask 261120   ;;  %v30_v2 = vld [vmem:[#allocation2 + $0x8] sm:$0xff]  ;;  %v196_v7 = vmov 0  }
  0x14   :  { %v125_v1 = vld [vmem:[%s253_s1] ss:$0 sm:$0xff]  ;;  %131 = vset.pattern.permute.xlu1 %v196_v7  ;;  %132 = vset.pattern.permute.xlu0 %v196_v7  ;;  %vm56_vm1 = vcmask 7168   ;;  %s197_s1 = smov [#allocation5]   ;;  %vm105_vm2 = vcmask 1041409   ;;  %vm108_vm3 = vcmask 254976  }
  0x15   :  { %v39_v3 = vmul.f32 %v125_v1, %v29_v0  ;;  %v40_v4 = vmul.f32 %v125_v1, %v30_v2  ;;  %v32_v8 = vld [vmem:[%s254_s2] sm:$0xff]  ;;  %s116_s2 = sshll.u32 %s197_s1, 4  ;;  %s117_s2 = int_to_ptr.vmem [resolvable:$true] %s116_s2 }
  0x16   :  { %s167_s29 = scalar_lea.vmem %s117_s2, 32  ;;  %p172_p9 = scmp.lt.s32.totalorder %s117_s2, %s117_s2 }
  0x17   :  { %v42_v5 = vsel %vm41_vm0, %v39_v3, 0.0  ;;  %v45_v6 = vsel %vm41_vm0, %v40_v4, 0.0  ;;  %p168_p8 = scmp.ne.s32.totalorder %s117_s2, %s167_s29  ;;  %p173_p10 = scmp.lt.s32.totalorder %s167_s29, %s167_s29 }
  0x18   :  { %43 = vadd.xlane.f32.xlu0 %v42_v5 }
  0x19   :  { %p174_p11 = por %p173_p10, %p172_p9 }
  0x1b   :  { %p175_p12 = pnand %p174_p11, %p168_p8 }
  0x1c   :  { %46 = vadd.xlane.f32.xlu0 %v45_v6 }
  0xa5   :  { %v44_v9 = vpop.xlane.xlu0 %43 }
  0xa6   :  { %v48_v10 = vadd.f32 %v44_v9, %v32_v8 }
  0xa8   :  { %133 = vtanh.f32 %v48_v10 }
  0xa9   :  { %v47_v11 = vpop.xlane.xlu0 %46 }
  0xaa   :  { %v49_v12 = vadd.f32 %v47_v11, %v32_v8 }
  0xac   :  { %135 = vtanh.f32 %v49_v12 }
  0xb2   :  { %v134_v13 = vpop.eup %133 }
  0xb3   :  { %v52_v14 = vmul.f32 1.442695, %v134_v13 }
  0xb5   :  { %137 = vpow2.f32 %v52_v14 }
  0xb6   :  { %v136_v15 = vpop.eup %135 }
  0xb7   :  { %v54_v16 = vmul.f32 1.442695, %v136_v15 }
  0xb9   :  { %139 = vpow2.f32 %v54_v16 }
  0xbf   :  { %v138_v17 = vpop.eup %137 }
  0xc0   :  { %v57_v18 = vsel %vm56_vm1, %v138_v17, 0.0 }
  0xc1   :  { %v58_v19 = vrot.slane %v57_v18, 4 }
  0xc3   :  { %v140_v20 = vpop.eup %139  ;;  %v59_v21 = vadd.f32 %v58_v19, %v57_v18 }
  0xc4   :  { %v64_v22 = vsel %vm56_vm1, %v140_v20, 0.0 }
  0xc5   :  { %v65_v23 = vrot.slane %v64_v22, 4  ;;  %v60_v24 = vrot.slane %v59_v21, 2 }
  0xc7   :  { %v66_v25 = vadd.f32 %v65_v23, %v64_v22  ;;  %v61_v26 = vadd.f32 %v60_v24, %v59_v21 }
  0xc9   :  { %v67_v27 = vrot.slane %v66_v25, 2  ;;  %v62_v28 = vrot.slane %v61_v26, 1 }
  0xcb   :  { %v63_v29 = vadd.f32 %v62_v28, %v61_v26  ;;  %v68_v30 = vadd.f32 %v67_v27, %v66_v25 }
  0xcd   :  { %141 = vrcp.f32 %v63_v29  ;;  %v69_v31 = vrot.slane %v68_v30, 1 }
  0xcf   :  { %v70_v32 = vadd.f32 %v69_v31, %v68_v30 }
  0xd1   :  { %143 = vrcp.f32 %v70_v32 }
  0xd7   :  { %v142_v33 = vpop.eup %141 }
  0xd8   :  { %v72_v34 = vmul.f32 %v142_v33, %v138_v17 }
  0xda   :  { %v75_v35 = vadd.f32 1e-10, %v72_v34 }
  0xdb   :  { %v144_v36 = vpop.eup %143 }
  0xdc   :  { %79 = vperm.xlu1 %131, %v75_v35   ;;  %v74_v37 = vmul.f32 %v144_v36, %v140_v20 }
  0xde   :  { %v76_v38 = vadd.f32 1e-10, %v74_v37 }
  0xe0   :  { %84 = vperm.xlu1 %131, %v76_v38  }
 0x15b   :  { %v80_v39 = vpop.permute.xlu1 %79 }
 0x15c   :  { %v87_v40 = vmul.f32 %v80_v39, %v29_v0 }
 0x15e   :  { %v89_v41 = vsel %vm41_vm0, %v87_v40, 0.0 }
 0x15f   :  { %v90_v42 = vrot.slane %v89_v41, 4  ;;  %v85_v43 = vpop.permute.xlu1 %84 }
 0x160   :  { %v88_v44 = vmul.f32 %v85_v43, %v30_v2 }
 0x161   :  { %v91_v45 = vadd.f32 %v90_v42, %v89_v41 }
 0x162   :  { %v96_v46 = vsel %vm41_vm0, %v88_v44, 0.0 }
 0x163   :  { %v92_v47 = vrot.slane %v91_v45, 2  ;;  %v97_v48 = vrot.slane %v96_v46, 4 }
 0x165   :  { %v93_v49 = vadd.f32 %v92_v47, %v91_v45  ;;  %v98_v50 = vadd.f32 %v97_v48, %v96_v46 }
 0x167   :  { %v99_v51 = vrot.slane %v98_v50, 2  ;;  %v94_v52 = vrot.slane %v93_v49, 1 }
 0x169   :  { %v100_v53 = vadd.f32 %v99_v51, %v98_v50  ;;  %v95_v55 = vadd.f32 %v94_v52, %v93_v49 }
 0x16b   :  { %v101_v54 = vrot.slane %v100_v53, 1 }
 0x16d   :  { %v102_v56 = vadd.f32 %v101_v54, %v100_v53 }
 0x16f   :  { %v106_v57 = vsel %vm105_vm2, %v102_v56, %v95_v55 }
 0x170   :  { %109 = vst.msk [vmem:[#allocation5] sm:$0x3] %vm108_vm3, %v106_v57 }
 0x171   :  { %178 = shalt.err (!%p175_p12)
}
 0x172   :  { %s179_s5 = scalar_lea.hbm %s255_s3, 32 }
 0x173   :  { %p180_p13 = scmp.ne.s32.totalorder %s255_s3, %s179_s5  ;;  %p183_p0 = scmp.lt.u32.totalorder %s179_s5, %s255_s3 }
 0x175   :  { %p185_p1 = pnand %p183_p0, %p180_p13 }
 0x177   :  { %188 = shalt.err (!%p185_p1)
}
 0x178   :  { %119 = dma.vmem_to_hbm [thread:$0]  %s117_s2, 32, %s255_s3, [#allocation4]  }
 0x179   :  { %191 = dma.done.wait [#allocation4], 32  }
 0x17a   :  { %192 = vsyncadd [#allocation4], 4294967264 }
 0x17b   :  { %123 = vsyncpa [#allocation3], 1 }
 0x17c   :  { %124 = vsyncpa [#allocation4], 1 }

</bundles_post_ra>
